<compile_context>
chip_gen: v7x
topology: tpu7x:2x2x1
jax: 0.10.0
libtpu: 0.0.40
codegen_flags: <defaults>
</compile_context>

<pallas_src>
from functools import partial

import numpy as np

import jax
import jax.numpy as jnp
from jax.experimental import pallas as pl
from jax.experimental.pallas import tpu as pltpu


def _round_up(x, m):
    return ((x + m - 1) // m) * m


def _zero_tail_kernel(valid_ref, x_ref, o_ref, *, row_offset):
    """Write back this tail frame-tile: frames < valid are copied, frames >= valid
    (i.e. the last `cut` frames) are zeroed.  Tiles fully below `valid` take the
    straight-copy branch."""
    tile_t = x_ref.shape[0]
    row0 = row_offset + pl.program_id(0) * tile_t
    valid = valid_ref[0]                               # SMEM scalar: T - cut

    @pl.when(row0 + tile_t <= valid)
    def _copy():                                       # tile entirely kept
        o_ref[...] = x_ref[...]

    @pl.when(row0 + tile_t > valid)
    def _mask():                                       # straddling / fully-cut tile
        def body(r, carry):
            keep = (row0 + r) < valid                  # scalar predicate per frame
            frame = x_ref[r]                           # (B, F)
            o_ref[r] = jnp.where(keep, frame, jnp.zeros_like(frame))
            return carry

        jax.lax.fori_loop(0, tile_t, body, 0, unroll=bool(tile_t <= 32))


def _pick_tile_t(T, B, F, dtype, max_zero, vmem_budget_bytes=8 << 20):
    """Tail tile height: ~max_cut-1 frames (<= 2 grid steps over the tail),
    capped so the 2-in + 2-out double-buffered footprint stays far below every
    generation's scoped-VMEM default (v5e's 16 MiB is the tightest)."""
    itemsize = jnp.dtype(dtype).itemsize
    sub = {1: 32, 2: 16, 4: 8}.get(itemsize, 8)
    slab = _round_up(B, sub) * _round_up(F, 128) * itemsize   # padded (B, F) frame
    cap = max(1, vmem_budget_bytes // (4 * slab))
    return max(1, min(T, max_zero, cap))


@partial(jax.jit, static_argnames=("max_cut", "tile_t", "zero_tail"),
         donate_argnums=(0,))
def random_cut(x, key, max_cut=10, tile_t=None, zero_tail=True):
    """Pallas equivalent of RandomCut(max_cut).forward(x).

    x is DONATED: its HBM buffer is reused in place by the kernel.
    Returns (out, cut): `out` has the static shape of x, out[:T-cut] == x[:-cut]
    and the trailing `cut` frames are zeroed; `cut` is the on-device scalar so
    callers can slice.  With zero_tail=False no kernel runs and (x, cut) is
    returned unchanged (for consumers that always slice out[:T-cut]).
    """
    if max_cut < 2:
        raise ValueError("max_cut must be >= 2 (torch.randint(1, max_cut))")
    T, B, F = x.shape

    # side = randint(0, 1) is always 0 -> always cut from the end.
    # TODO(synk): the `side == 1` branch of the reference is dead code
    # (torch.randint(0, 1) can only return 0), so it is intentionally omitted.
    cut = jax.random.randint(key, (), 1, max_cut, dtype=jnp.int32)
    # TODO(synk): clamp keeps >=1 surviving frame when max_cut >= T; the
    # PyTorch reference would instead return an empty/ill-shaped tensor there.
    cut = jnp.minimum(cut, T - 1)

    max_zero = min(max_cut - 1, T - 1)              # most frames that can ever be zeroed
    if not zero_tail or max_zero == 0:
        return x, cut

    valid = (jnp.int32(T) - cut).reshape((1,))      # scalar-prefetch operand: T - cut

    if tile_t is None:
        tile_t = _pick_tile_t(T, B, F, x.dtype, max_zero)
    tile_t = max(1, min(int(tile_t), T))

    total_tiles = pl.cdiv(T, tile_t)
    first_tail_tile = (T - max_zero) // tile_t      # first tile that can hold a cut frame
    num_tail_tiles = total_tiles - first_tail_tile  # >= 1; typically 1-2
    row_offset = first_tail_tile * tile_t

    out = pl.pallas_call(
        partial(_zero_tail_kernel, row_offset=row_offset),
        out_shape=jax.ShapeDtypeStruct((T, B, F), x.dtype),
        grid_spec=pltpu.PrefetchScalarGridSpec(
            num_scalar_prefetch=1,
            grid=(num_tail_tiles,),
            # index_maps receive the scalar-prefetch ref as a trailing arg.
            # (B, F) are taken whole, so the (8,128) BlockSpec rule is satisfied
            # for any dtype and any tile_t (tile_t is a leading, untiled dim).
            in_specs=[pl.BlockSpec((tile_t, B, F),
                                   lambda i, v: (first_tail_tile + i, 0, 0))],
            out_specs=pl.BlockSpec((tile_t, B, F),
                                   lambda i, v: (first_tail_tile + i, 0, 0)),
        ),
        # Output 0 aliases input 1 (x, donated): tiles the grid never visits
        # keep the original frames in place with zero extra HBM traffic.
        input_output_aliases={1: 0},
        compiler_params=pltpu.CompilerParams(
            dimension_semantics=("arbitrary",),
        ),
    )(valid, x)

    return out, cut


if __name__ == "__main__":
    key = jax.random.PRNGKey(0)
    k_data, k_cut = jax.random.split(key)

    # Small shapes consistent with the module: (seq=64, batch=2, feature=32).
    # T=64 with max_cut=10 exercises BOTH paths: alias-untouched leading tiles
    # and the masked tail tiles.
    T, B, F = 64, 2, 32
    x = jax.random.normal(k_data, (T, B, F), dtype=jnp.float32)
    x_host = np.asarray(x)                 # snapshot: x's device buffer is donated below

    y, cut = random_cut(x, k_cut, max_cut=10)
    y = jax.block_until_ready(y)

    cut_i = int(cut)                       # host readback only for the test check
    assert 1 <= cut_i <= 9, cut_i
    ref = x_host[: T - cut_i, :, :]        # PyTorch: x[:-cut, :, :]
    assert y.shape == (T, B, F), y.shape
    y_host = np.asarray(y)
    assert np.allclose(y_host[: T - cut_i], ref), "valid prefix mismatch"
    assert np.all(y_host[T - cut_i:] == 0), "tail not zeroed"

    print("KERNEL_OK")
</pallas_src>

<mosaic_0001>
module attributes {stable_mosaic.version = 11 : i64} {
  func.func @_zero_tail_kernel(%arg0: i32, %arg1: memref<1xi32, #tpu.memory_space<smem>>, %arg2: memref<9x2x32xf32, #tpu.memory_space<vmem>>, %arg3: memref<9x2x32xf32, #tpu.memory_space<vmem>>) attributes {dimension_semantics = [#tpu.dimension_semantics<arbitrary>], iteration_bounds = array<i64: 2>, scalar_prefetch = 1 : i64, scratch_operands = 0 : i64, tpu.core_type = #tpu.core_type<tc>, window_params = [{transform_indices = @transform_0, window_bounds = array<i64: 9, 2, 32>}, {transform_indices = @transform_1, window_bounds = array<i64: 9, 2, 32>}]} {
    %c9_i32 = arith.constant 9 : i32
    %0 = arith.muli %arg0, %c9_i32 : i32
    %c54_i32 = arith.constant 54 : i32
    %1 = arith.addi %c54_i32, %0 : i32
    %c0 = arith.constant 0 : index
    %2 = memref.load %arg1[%c0] : memref<1xi32, #tpu.memory_space<smem>>
    %c9_i32_0 = arith.constant 9 : i32
    %3 = arith.addi %1, %c9_i32_0 : i32
    %4 = arith.cmpi sle, %3, %2 : i32
    %5 = arith.extui %4 : i1 to i32
    %c0_i32 = arith.constant 0 : i32
    %6 = arith.cmpi ne, %5, %c0_i32 : i32
    scf.if %6 {
      %c0_3 = arith.constant 0 : index
      %c0_4 = arith.constant 0 : index
      %c0_5 = arith.constant 0 : index
      %11 = vector.load %arg2[%c0_3, %c0_4, %c0_5] : memref<9x2x32xf32, #tpu.memory_space<vmem>>, vector<9x2x32xf32>
      %c0_6 = arith.constant 0 : index
      %c0_7 = arith.constant 0 : index
      %c0_8 = arith.constant 0 : index
      %12 = vector.load %arg3[%c0_6, %c0_7, %c0_8] : memref<9x2x32xf32, #tpu.memory_space<vmem>>, vector<9x2x32xf32>
      tpu.vector_store %arg3[%c0_6, %c0_7, %c0_8], %11 {strides = array<i32>} : memref<9x2x32xf32, #tpu.memory_space<vmem>>, vector<9x2x32xf32>,
    } else {
    }
    %c9_i32_1 = arith.constant 9 : i32
    %7 = arith.addi %1, %c9_i32_1 : i32
    %8 = arith.cmpi sgt, %7, %2 : i32
    %9 = arith.extui %8 : i1 to i32
    %c0_i32_2 = arith.constant 0 : i32
    %10 = arith.cmpi ne, %9, %c0_i32_2 : i32
    scf.if %10 {
      %c0_i32_3 = arith.constant 0 : i32
      %11 = arith.addi %1, %c0_i32_3 : i32
      %12 = arith.cmpi slt, %11, %2 : i32
      %13 = arith.index_cast %c0_i32_3 : i32 to index
      %c0_4 = arith.constant 0 : index
      %c0_5 = arith.constant 0 : index
      %14 = vector.load %arg2[%13, %c0_4, %c0_5] : memref<9x2x32xf32, #tpu.memory_space<vmem>>, vector<1x2x32xf32>
      %15 = vector.shape_cast %14 : vector<1x2x32xf32> to vector<2x32xf32>
      %cst = arith.constant 0.000000e+00 : f32
      %16 = vector.broadcast %cst : f32 to vector<2x32xf32>
      %17 = arith.select %12, %15, %16 : vector<2x32xf32>
      %18 = arith.index_cast %c0_i32_3 : i32 to index
      %c0_6 = arith.constant 0 : index
      %c0_7 = arith.constant 0 : index
      %19 = vector.load %arg3[%18, %c0_6, %c0_7] : memref<9x2x32xf32, #tpu.memory_space<vmem>>, vector<1x2x32xf32>
      %20 = vector.shape_cast %19 : vector<1x2x32xf32> to vector<2x32xf32>
      %21 = vector.shape_cast %17 : vector<2x32xf32> to vector<1x2x32xf32>
      tpu.vector_store %arg3[%18, %c0_6, %c0_7], %21 {strides = array<i32>} : memref<9x2x32xf32, #tpu.memory_space<vmem>>, vector<1x2x32xf32>,
      %c1_i32 = arith.constant 1 : i32
      %22 = arith.addi %1, %c1_i32 : i32
      %23 = arith.cmpi slt, %22, %2 : i32
      %24 = arith.index_cast %c1_i32 : i32 to index
      %c0_8 = arith.constant 0 : index
      %c0_9 = arith.constant 0 : index
      %25 = vector.load %arg2[%24, %c0_8, %c0_9] : memref<9x2x32xf32, #tpu.memory_space<vmem>>, vector<1x2x32xf32>
      %26 = vector.shape_cast %25 : vector<1x2x32xf32> to vector<2x32xf32>
      %cst_10 = arith.constant 0.000000e+00 : f32
      %27 = vector.broadcast %cst_10 : f32 to vector<2x32xf32>
      %28 = arith.select %23, %26, %27 : vector<2x32xf32>
      %29 = arith.index_cast %c1_i32 : i32 to index
      %c0_11 = arith.constant 0 : index
      %c0_12 = arith.constant 0 : index
      %30 = vector.load %arg3[%29, %c0_11, %c0_12] : memref<9x2x32xf32, #tpu.memory_space<vmem>>, vector<1x2x32xf32>
      %31 = vector.shape_cast %30 : vector<1x2x32xf32> to vector<2x32xf32>
      %32 = vector.shape_cast %28 : vector<2x32xf32> to vector<1x2x32xf32>
      tpu.vector_store %arg3[%29, %c0_11, %c0_12], %32 {strides = array<i32>} : memref<9x2x32xf32, #tpu.memory_space<vmem>>, vector<1x2x32xf32>,
      %c2_i32 = arith.constant 2 : i32
      %33 = arith.addi %1, %c2_i32 : i32
      %34 = arith.cmpi slt, %33, %2 : i32
      %35 = arith.index_cast %c2_i32 : i32 to index
      %c0_13 = arith.constant 0 : index
      %c0_14 = arith.constant 0 : index
      %36 = vector.load %arg2[%35, %c0_13, %c0_14] : memref<9x2x32xf32, #tpu.memory_space<vmem>>, vector<1x2x32xf32>
      %37 = vector.shape_cast %36 : vector<1x2x32xf32> to vector<2x32xf32>
      %cst_15 = arith.constant 0.000000e+00 : f32
      %38 = vector.broadcast %cst_15 : f32 to vector<2x32xf32>
      %39 = arith.select %34, %37, %38 : vector<2x32xf32>
      %40 = arith.index_cast %c2_i32 : i32 to index
      %c0_16 = arith.constant 0 : index
      %c0_17 = arith.constant 0 : index
      %41 = vector.load %arg3[%40, %c0_16, %c0_17] : memref<9x2x32xf32, #tpu.memory_space<vmem>>, vector<1x2x32xf32>
      %42 = vector.shape_cast %41 : vector<1x2x32xf32> to vector<2x32xf32>
      %43 = vector.shape_cast %39 : vector<2x32xf32> to vector<1x2x32xf32>
      tpu.vector_store %arg3[%40, %c0_16, %c0_17], %43 {strides = array<i32>} : memref<9x2x32xf32, #tpu.memory_space<vmem>>, vector<1x2x32xf32>,
      %c3_i32 = arith.constant 3 : i32
      %44 = arith.addi %1, %c3_i32 : i32
      %45 = arith.cmpi slt, %44, %2 : i32
      %46 = arith.index_cast %c3_i32 : i32 to index
      %c0_18 = arith.constant 0 : index
      %c0_19 = arith.constant 0 : index
      %47 = vector.load %arg2[%46, %c0_18, %c0_19] : memref<9x2x32xf32, #tpu.memory_space<vmem>>, vector<1x2x32xf32>
      %48 = vector.shape_cast %47 : vector<1x2x32xf32> to vector<2x32xf32>
      %cst_20 = arith.constant 0.000000e+00 : f32
      %49 = vector.broadcast %cst_20 : f32 to vector<2x32xf32>
      %50 = arith.select %45, %48, %49 : vector<2x32xf32>
      %51 = arith.index_cast %c3_i32 : i32 to index
      %c0_21 = arith.constant 0 : index
      %c0_22 = arith.constant 0 : index
      %52 = vector.load %arg3[%51, %c0_21, %c0_22] : memref<9x2x32xf32, #tpu.memory_space<vmem>>, vector<1x2x32xf32>
      %53 = vector.shape_cast %52 : vector<1x2x32xf32> to vector<2x32xf32>
      %54 = vector.shape_cast %50 : vector<2x32xf32> to vector<1x2x32xf32>
      tpu.vector_store %arg3[%51, %c0_21, %c0_22], %54 {strides = array<i32>} : memref<9x2x32xf32, #tpu.memory_space<vmem>>, vector<1x2x32xf32>,
      %c4_i32 = arith.constant 4 : i32
      %55 = arith.addi %1, %c4_i32 : i32
      %56 = arith.cmpi slt, %55, %2 : i32
      %57 = arith.index_cast %c4_i32 : i32 to index
      %c0_23 = arith.constant 0 : index
      %c0_24 = arith.constant 0 : index
      %58 = vector.load %arg2[%57, %c0_23, %c0_24] : memref<9x2x32xf32, #tpu.memory_space<vmem>>, vector<1x2x32xf32>
      %59 = vector.shape_cast %58 : vector<1x2x32xf32> to vector<2x32xf32>
      %cst_25 = arith.constant 0.000000e+00 : f32
      %60 = vector.broadcast %cst_25 : f32 to vector<2x32xf32>
      %61 = arith.select %56, %59, %60 : vector<2x32xf32>
      %62 = arith.index_cast %c4_i32 : i32 to index
      %c0_26 = arith.constant 0 : index
      %c0_27 = arith.constant 0 : index
      %63 = vector.load %arg3[%62, %c0_26, %c0_27] : memref<9x2x32xf32, #tpu.memory_space<vmem>>, vector<1x2x32xf32>
      %64 = vector.shape_cast %63 : vector<1x2x32xf32> to vector<2x32xf32>
      %65 = vector.shape_cast %61 : vector<2x32xf32> to vector<1x2x32xf32>
      tpu.vector_store %arg3[%62, %c0_26, %c0_27], %65 {strides = array<i32>} : memref<9x2x32xf32, #tpu.memory_space<vmem>>, vector<1x2x32xf32>,
      %c5_i32 = arith.constant 5 : i32
      %66 = arith.addi %1, %c5_i32 : i32
      %67 = arith.cmpi slt, %66, %2 : i32
      %68 = arith.index_cast %c5_i32 : i32 to index
      %c0_28 = arith.constant 0 : index
      %c0_29 = arith.constant 0 : index
      %69 = vector.load %arg2[%68, %c0_28, %c0_29] : memref<9x2x32xf32, #tpu.memory_space<vmem>>, vector<1x2x32xf32>
      %70 = vector.shape_cast %69 : vector<1x2x32xf32> to vector<2x32xf32>
      %cst_30 = arith.constant 0.000000e+00 : f32
      %71 = vector.broadcast %cst_30 : f32 to vector<2x32xf32>
      %72 = arith.select %67, %70, %71 : vector<2x32xf32>
      %73 = arith.index_cast %c5_i32 : i32 to index
      %c0_31 = arith.constant 0 : index
      %c0_32 = arith.constant 0 : index
      %74 = vector.load %arg3[%73, %c0_31, %c0_32] : memref<9x2x32xf32, #tpu.memory_space<vmem>>, vector<1x2x32xf32>
      %75 = vector.shape_cast %74 : vector<1x2x32xf32> to vector<2x32xf32>
      %76 = vector.shape_cast %72 : vector<2x32xf32> to vector<1x2x32xf32>
      tpu.vector_store %arg3[%73, %c0_31, %c0_32], %76 {strides = array<i32>} : memref<9x2x32xf32, #tpu.memory_space<vmem>>, vector<1x2x32xf32>,
      %c6_i32 = arith.constant 6 : i32
      %77 = arith.addi %1, %c6_i32 : i32
      %78 = arith.cmpi slt, %77, %2 : i32
      %79 = arith.index_cast %c6_i32 : i32 to index
      %c0_33 = arith.constant 0 : index
      %c0_34 = arith.constant 0 : index
      %80 = vector.load %arg2[%79, %c0_33, %c0_34] : memref<9x2x32xf32, #tpu.memory_space<vmem>>, vector<1x2x32xf32>
      %81 = vector.shape_cast %80 : vector<1x2x32xf32> to vector<2x32xf32>
      %cst_35 = arith.constant 0.000000e+00 : f32
      %82 = vector.broadcast %cst_35 : f32 to vector<2x32xf32>
      %83 = arith.select %78, %81, %82 : vector<2x32xf32>
      %84 = arith.index_cast %c6_i32 : i32 to index
      %c0_36 = arith.constant 0 : index
      %c0_37 = arith.constant 0 : index
      %85 = vector.load %arg3[%84, %c0_36, %c0_37] : memref<9x2x32xf32, #tpu.memory_space<vmem>>, vector<1x2x32xf32>
      %86 = vector.shape_cast %85 : vector<1x2x32xf32> to vector<2x32xf32>
      %87 = vector.shape_cast %83 : vector<2x32xf32> to vector<1x2x32xf32>
      tpu.vector_store %arg3[%84, %c0_36, %c0_37], %87 {strides = array<i32>} : memref<9x2x32xf32, #tpu.memory_space<vmem>>, vector<1x2x32xf32>,
      %c7_i32 = arith.constant 7 : i32
      %88 = arith.addi %1, %c7_i32 : i32
      %89 = arith.cmpi slt, %88, %2 : i32
      %90 = arith.index_cast %c7_i32 : i32 to index
      %c0_38 = arith.constant 0 : index
      %c0_39 = arith.constant 0 : index
      %91 = vector.load %arg2[%90, %c0_38, %c0_39] : memref<9x2x32xf32, #tpu.memory_space<vmem>>, vector<1x2x32xf32>
      %92 = vector.shape_cast %91 : vector<1x2x32xf32> to vector<2x32xf32>
      %cst_40 = arith.constant 0.000000e+00 : f32
      %93 = vector.broadcast %cst_40 : f32 to vector<2x32xf32>
      %94 = arith.select %89, %92, %93 : vector<2x32xf32>
      %95 = arith.index_cast %c7_i32 : i32 to index
      %c0_41 = arith.constant 0 : index
      %c0_42 = arith.constant 0 : index
      %96 = vector.load %arg3[%95, %c0_41, %c0_42] : memref<9x2x32xf32, #tpu.memory_space<vmem>>, vector<1x2x32xf32>
      %97 = vector.shape_cast %96 : vector<1x2x32xf32> to vector<2x32xf32>
      %98 = vector.shape_cast %94 : vector<2x32xf32> to vector<1x2x32xf32>
      tpu.vector_store %arg3[%95, %c0_41, %c0_42], %98 {strides = array<i32>} : memref<9x2x32xf32, #tpu.memory_space<vmem>>, vector<1x2x32xf32>,
      %c8_i32 = arith.constant 8 : i32
      %99 = arith.addi %1, %c8_i32 : i32
      %100 = arith.cmpi slt, %99, %2 : i32
      %101 = arith.index_cast %c8_i32 : i32 to index
      %c0_43 = arith.constant 0 : index
      %c0_44 = arith.constant 0 : index
      %102 = vector.load %arg2[%101, %c0_43, %c0_44] : memref<9x2x32xf32, #tpu.memory_space<vmem>>, vector<1x2x32xf32>
      %103 = vector.shape_cast %102 : vector<1x2x32xf32> to vector<2x32xf32>
      %cst_45 = arith.constant 0.000000e+00 : f32
      %104 = vector.broadcast %cst_45 : f32 to vector<2x32xf32>
      %105 = arith.select %100, %103, %104 : vector<2x32xf32>
      %106 = arith.index_cast %c8_i32 : i32 to index
      %c0_46 = arith.constant 0 : index
      %c0_47 = arith.constant 0 : index
      %107 = vector.load %arg3[%106, %c0_46, %c0_47] : memref<9x2x32xf32, #tpu.memory_space<vmem>>, vector<1x2x32xf32>
      %108 = vector.shape_cast %107 : vector<1x2x32xf32> to vector<2x32xf32>
      %109 = vector.shape_cast %105 : vector<2x32xf32> to vector<1x2x32xf32>
      tpu.vector_store %arg3[%106, %c0_46, %c0_47], %109 {strides = array<i32>} : memref<9x2x32xf32, #tpu.memory_space<vmem>>, vector<1x2x32xf32>,
      %c9_i32_48 = arith.constant 9 : i32
    } else {
    }
    return
  }
  func.func @transform_0(%arg0: i32, %arg1: memref<1xi32, #tpu.memory_space<smem>>) -> (i32, i32, i32) {
    %c6_i32 = arith.constant 6 : i32
    %0 = arith.addi %c6_i32, %arg0 : i32
    %c0_i32 = arith.constant 0 : i32
    %c0_i32_0 = arith.constant 0 : i32
    %c0_i32_1 = arith.constant 0 : i32
    return %0, %c0_i32, %c0_i32_0 : i32, i32, i32
  }
  func.func @transform_1(%arg0: i32, %arg1: memref<1xi32, #tpu.memory_space<smem>>) -> (i32, i32, i32) {
    %c6_i32 = arith.constant 6 : i32
    %0 = arith.addi %c6_i32, %arg0 : i32
    %c0_i32 = arith.constant 0 : i32
    %c0_i32_0 = arith.constant 0 : i32
    %c0_i32_1 = arith.constant 0 : i32
    return %0, %c0_i32, %c0_i32_0 : i32, i32, i32
  }
}

</mosaic_0001>

<bundles_post_ra>
// kernel: random_cut.1
= control target key start
LH: loop header
LB: loop body
LE: loop exit
PB: predicated region body
PF: predicated region fallthrough
CT: control target
= control target key end

     0   :  { %s981_s0 = inlined_call_operand.<no memory space> [shape: s32[1], index: 0, kind: input, shape index: {}]   ;;  %s982_s1 = inlined_call_operand.vmem [shape: f32[64,2,32], index: 1, kind: input, shape index: {}, may-alias: {1,2}]   ;;  %s983_s2 = inlined_call_operand.vmem [shape: f32[64,2,32], index: 2, kind: output, shape index: {}, may-alias: {1,2}]  }
   0x1   :  { %7 = sst [smem:[#allocation3]] %s981_s0 }
   0x2   :  { %s758_s11 = smov 0   ;;  %s760_s12 = smov 0  }
   0x3   :  { %s762_s13 = smov 0  }
   0x4 LB: > { %s769_s14 = sadd.s32 4294967295, %s706_s13   ;;  %s771_s0 = sadd.s32 1, %s706_s13   ;;  %s706_s13 = sphi %s762_s13, %s995_s13   ;;  %s702_s12 = sphi %s760_s12, %s994_s12   ;;  %s698_s11 = sphi %s758_s11, %s993_s11  }
   0x5   : > { %s45_s15 = sadd.s32 6, %s706_s13  ;;  %s46_s16 = sadd.s32 6, %s771_s0 }
   0x6   : > { %s47_s17 = ssub.s32 %s45_s15, %s46_s16  ;;  %s50_s18 = sadd.s32 1, %s702_s12 }
   0x7   : > { %p48_p0 = scmp.eq.s32.totalorder %s47_s17, 0  ;;  %p60_p1 = scmp.ne.s32.totalorder %s702_s12, %s698_s11 }
   0x8   : > { %p61_p2 = scmp.eq.s32.totalorder %s769_s14, 1  ;;  %p528_p3 = scmp.ge.s32.totalorder %s706_s13, 1 }
   0x9   : > { %s778_s19 = scalar_select %p48_p0, %s702_s12, %s50_s18  }
   0xa   : > { %p780_p4 = por %p61_p2, %p60_p1  ;;  %p104_p5 = scmp.lt.s32.totalorder %s706_s13, 3 }
   0xc   : > { %p105_p6 = pnand %p528_p3, %p104_p5 }
   0xd   : > { %s125_s21 = sand.u32 (!%p105_p6), 1, %s698_s11   ;;  %s128_s22 = sadd.s32 (!%p105_p6), 6, %s769_s14 }
   0xe   : > { %108 = sbr.rel (%p105_p6) target bundleno = 132 (0x84), region = 24  ;;  %s785_s24 = sld [smem:[#allocation3]] (!%p105_p6) }
   0xf   : > { %s558_s23 = smul.u32 (!%p105_p6), 18, %s125_s21 }
  0x10   : > { %s787_s25 = smul.u32 (!%p105_p6), 9, %s128_s22 }
  0x11   : > { %s790_s26 = smul.u32 (!%p105_p6), 9, %s769_s14  ;;  %s801_s6 = scalar_lea.vmem (!%p105_p6), [#allocation4], %s558_s23  }
  0x12   : > { %p134_p7 = scmp.lt.s32.totalorder (!%p105_p6), %s787_s25, 63 }
  0x13   : > { %s151_s27 = sadd.s32 (!%p105_p6), 54, %s790_s26  ;;  %s153_s28 = sadd.s32 (!%p105_p6), 63, %s790_s26 }
  0x14   : > { %p530_p8 = scmp.gt.s32.totalorder (!%p105_p6), %s153_s28, %s785_s24 }
  0x15   : > { %s135_s29 = scalar_select %p134_p7, %s787_s25, 63 }
  0x16   : > { %157 = sbr.rel (%p530_p8) target bundleno = 32 (0x20), region = 28  ;;  %vm167_vm0 = vcmask (!%p530_p8), 254976  }
  0x17   : > { %s529_s30 = sshll.u32 %s135_s29, 1 }
  0x18   : > { %s799_s5 = scalar_lea.vmem %s982_s1, %s529_s30 }
  0x19   : > { %v158_v0 = vld [vmem:[%s799_s5] sm:$0x3] (!%p530_p8)  ;;  %v159_v1 = vld [vmem:[%s799_s5 + $0x2] sm:$0x3] (!%p530_p8)  ;;  %v160_v2 = vld [vmem:[%s799_s5 + $0x4] sm:$0x3] (!%p530_p8) }
  0x1a   : > { %168 = vst.msk [vmem:[%s801_s6] sm:$0x3] (!%p530_p8), %vm167_vm0, %v158_v0  ;;  %169 = vst.msk [vmem:[%s801_s6 + $0x2] sm:$0x3] (!%p530_p8), %vm167_vm0, %v159_v1  ;;  %v161_v3 = vld [vmem:[%s799_s5 + $0x6] sm:$0x3] (!%p530_p8) }
  0x1b   : > { %v162_v4 = vld [vmem:[%s799_s5 + $0x8] sm:$0x3] (!%p530_p8)  ;;  %170 = vst.msk [vmem:[%s801_s6 + $0x4] sm:$0x3] (!%p530_p8), %vm167_vm0, %v160_v2  ;;  %171 = vst.msk [vmem:[%s801_s6 + $0x6] sm:$0x3] (!%p530_p8), %vm167_vm0, %v161_v3 }
  0x1c   : > { %172 = vst.msk [vmem:[%s801_s6 + $0x8] sm:$0x3] (!%p530_p8), %vm167_vm0, %v162_v4  ;;  %v163_v5 = vld [vmem:[%s799_s5 + $0xa] sm:$0x3] (!%p530_p8)  ;;  %v164_v6 = vld [vmem:[%s799_s5 + $0xc] sm:$0x3] (!%p530_p8) }
  0x1d   : > { %v165_v7 = vld [vmem:[%s799_s5 + $0xe] sm:$0x3]  ;;  %173 = vst.msk [vmem:[%s801_s6 + $0xa] sm:$0x3] %vm167_vm0, %v163_v5  ;;  %174 = vst.msk [vmem:[%s801_s6 + $0xc] sm:$0x3] %vm167_vm0, %v164_v6 }
  0x1e   : > { %175 = vst.msk [vmem:[%s801_s6 + $0xe] sm:$0x3] %vm167_vm0, %v165_v7  ;;  %v166_v8 = vld [vmem:[%s799_s5 + $0x10] sm:$0x3] }
  0x1f   : > { %176 = vst.msk [vmem:[%s801_s6 + $0x10] sm:$0x3] %vm167_vm0, %v166_v8 }
  0x20 PF: > { %p531_p9 = scmp.le.s32.totalorder %s153_s28, %s785_s24 }
  0x21   : > { %p181_p10 = scmp.lt.s32.totalorder (!%p531_p9), %s151_s27, %s785_s24  ;;  %s189_s7 = sadd.s32 (!%p531_p9), 55, %s790_s26  ;;  %v182_v9 = vld [vmem:[%s799_s5] sm:$0x3] (!%p531_p9)  ;;  %vm187_vm1 = vcmask (!%p531_p9), 254976   ;;  %v532_v11 = vld [vmem:[%s799_s5 + $0x2] sm:$0x3] (!%p531_p9) }
  0x22   : > { %180 = sbr.rel (%p531_p9) target bundleno = 58 (0x3a), region = 32  ;;  %p190_p11 = scmp.lt.s32.totalorder (!%p531_p9), %s189_s7, %s785_s24  ;;  %v534_v15 = vld [vmem:[%s799_s5 + $0x4] sm:$0x3] (!%p531_p9)  ;;  %v536_v17 = vld [vmem:[%s799_s5 + $0x6] sm:$0x3] (!%p531_p9) }
  0x23   : > { %s199_s8 = sadd.s32 (!%p531_p9), 56, %s790_s26  ;;  %s209_s13 = sadd.s32 (!%p531_p9), 57, %s790_s26  ;;  %v538_v21 = vld [vmem:[%s799_s5 + $0x8] sm:$0x3] (!%p531_p9)  ;;  %v540_v23 = vld [vmem:[%s799_s5 + $0xa] sm:$0x3] (!%p531_p9) }
  0x24   : > { %p841_p12 = scmp.lt.s32.totalorder (!%p531_p9), %s199_s8, %s785_s24  ;;  %p847_p13 = scmp.lt.s32.totalorder (!%p531_p9), %s209_s13, %s785_s24  ;;  %v542_v27 = vld [vmem:[%s799_s5 + $0xc] sm:$0x3] (!%p531_p9)  ;;  %v544_v29 = vld [vmem:[%s799_s5 + $0xe] sm:$0x3] (!%p531_p9)  ;;  %v546_v33 = vld [vmem:[%s799_s5 + $0x10] sm:$0x3] (!%p531_p9) }
  0x25   : > { %s219_s16 = sadd.s32 (!%p531_p9), 58, %s790_s26  ;;  %s229_s22 = sadd.s32 (!%p531_p9), 59, %s790_s26 }
  0x26   : > { %p863_p0 = scmp.lt.s32.totalorder (!%p531_p9), %s219_s16, %s785_s24  ;;  %p869_p1 = scmp.lt.s32.totalorder (!%p531_p9), %s229_s22, %s785_s24 }
  0x27   : > { %s239_s27 = sadd.s32 (!%p531_p9), 60, %s790_s26  ;;  %s249_s3 = sadd.s32 (!%p531_p9), 61, %s790_s26 }
  0x28   : > { %p885_p2 = scmp.lt.s32.totalorder (!%p531_p9), %s239_s27, %s785_s24  ;;  %p891_p3 = scmp.lt.s32.totalorder (!%p531_p9), %s249_s3, %s785_s24 }
  0x29   : > { %s183_s9 = scalar_select %p181_p10, 1, 0 }
  0x2a   : > { %s193_s10 = scalar_select %p190_p11, 1, 0 }
  0x2b   : > { %v184_v10 = vstv %s183_s9  ;;  %s203_s17 = scalar_select %p841_p12, 1, 0 }
  0x2c   : > { %vm185_vm2 = vcmp.eq.s32.totalorder %v184_v10, 1  ;;  %v194_v12 = vstv %s193_s10  ;;  %s213_s18 = scalar_select %p847_p13, 1, 0 }
  0x2d   : > { %v186_v13 = vsel %vm185_vm2, %v182_v9, 0.0  ;;  %vm195_vm3 = vcmp.eq.s32.totalorder %v194_v12, 1  ;;  %v204_v16 = vstv %s203_s17  ;;  %s223_s28 = scalar_select %p863_p0, 1, 0 }
  0x2e   : > { %188 = vst.msk [vmem:[%s801_s6] sm:$0x3] %vm187_vm1, %v186_v13  ;;  %v196_v14 = vsel %vm195_vm3, %v532_v11, 0.0  ;;  %vm205_vm4 = vcmp.eq.s32.totalorder %v204_v16, 1  ;;  %v214_v18 = vstv %s213_s18  ;;  %s233_s29 = scalar_select %p869_p1, 1, 0 }
  0x2f   : > { %533 = vst.msk [vmem:[%s801_s6 + $0x2] sm:$0x3] %vm187_vm1, %v196_v14  ;;  %v206_v19 = vsel %vm205_vm4, %v534_v15, 0.0  ;;  %vm215_vm5 = vcmp.eq.s32.totalorder %v214_v18, 1  ;;  %v224_v22 = vstv %s223_s28  ;;  %s259_s7 = sadd.s32 62, %s790_s26 }
  0x30   : > { %535 = vst.msk [vmem:[%s801_s6 + $0x4] sm:$0x3] %vm187_vm1, %v206_v19  ;;  %v216_v20 = vsel %vm215_vm5, %v536_v17, 0.0  ;;  %vm225_vm6 = vcmp.eq.s32.totalorder %v224_v22, 1  ;;  %v234_v24 = vstv %s233_s29  ;;  %s243_s8 = scalar_select %p885_p2, 1, 0 }
  0x31   : > { %537 = vst.msk [vmem:[%s801_s6 + $0x6] sm:$0x3] %vm187_vm1, %v216_v20  ;;  %v226_v25 = vsel %vm225_vm6, %v538_v21, 0.0  ;;  %vm235_vm7 = vcmp.eq.s32.totalorder %v234_v24, 1  ;;  %s253_s9 = scalar_select %p891_p3, 1, 0 }
  0x32   : > { %539 = vst.msk [vmem:[%s801_s6 + $0x8] sm:$0x3] %vm187_vm1, %v226_v25  ;;  %v236_v26 = vsel %vm235_vm7, %v540_v23, 0.0  ;;  %v244_v28 = vstv %s243_s8  ;;  %p260_p5 = scmp.lt.s32.totalorder %s259_s7, %s785_s24 }
  0x33   : > { %541 = vst.msk [vmem:[%s801_s6 + $0xa] sm:$0x3] %vm187_vm1, %v236_v26  ;;  %vm245_vm8 = vcmp.eq.s32.totalorder %v244_v28, 1  ;;  %v254_v30 = vstv %s253_s9 }
  0x34   : > { %v246_v31 = vsel %vm245_vm8, %v542_v27, 0.0  ;;  %vm255_vm9 = vcmp.eq.s32.totalorder %v254_v30, 1  ;;  %s263_s26 = scalar_select %p260_p5, 1, 0 }
  0x35   : > { %543 = vst.msk [vmem:[%s801_s6 + $0xc] sm:$0x3] %vm187_vm1, %v246_v31  ;;  %v256_v32 = vsel %vm255_vm9, %v544_v29, 0.0 }
  0x36   : > { %545 = vst.msk [vmem:[%s801_s6 + $0xe] sm:$0x3] %vm187_vm1, %v256_v32  ;;  %v264_v34 = vstv %s263_s26 }
  0x37   : > { %vm265_vm10 = vcmp.eq.s32.totalorder %v264_v34, 1 }
  0x38   : > { %v266_v35 = vsel %vm265_vm10, %v546_v33, 0.0 }
  0x39   : > { %547 = vst.msk [vmem:[%s801_s6 + $0x10] sm:$0x3] %vm187_vm1, %v266_v35 }
  0x3a PF: > { %275 = sbr.rel (!%p780_p4) target bundleno = 132 (0x84), region = 36  ;;  %s278_s24 = ssub.s32 (%p780_p4), 64, %s787_s25 }
  0x3b   : > { %s441_s10 = smul.u32 (%p780_p4), 18, %s769_s14  ;;  %p279_p6 = scmp.lt.s32.totalorder (%p780_p4), %s278_s24, 9 }
  0x3d   : > { %s921_s5 = scalar_lea.vmem (%p780_p4), %s983_s2, %s441_s10 }
  0x3e   : > { %s443_s15 = scalar_lea.vmem (%p780_p4), %s921_s5, 108  }
  0x41   : > { %s997_s24 = smov (!%p279_p6, %s278_s24), 9 }
  0x42   : > { %s548_s16 = sshll.u32 %s997_s24, 5 }
  0x43   : > { %p550_p7 = scmp.eq.s32.totalorder %s548_s16, 0 }
  0x44   : > { %648 = sdivrem.u32 (!%p550_p7), %s997_s24, 9 }
  0x45   : > { %287 = sbr.rel (%p550_p7) target bundleno = 132 (0x84), region = 40 }
  0x4d   : > { %s928_s20 = spop.drf %648 }
  0x4e   : > { %p551_p4 = scmp.le.s32.totalorder %s928_s20, 0 }
  0x4f   : > { %s991_s14 = smov (!%p551_p4), %s801_s6  ;;  %s936_s25 = smov (!%p551_p4), 0  }
  0x50   : > { %481 = sbr.rel (%p551_p4) target bundleno = 103 (0x67), region = 128  ;;  %s938_s17 = smov (!%p551_p4), 0  }
  0x57 LB: >> { %v304_v36 = vld [vmem:[%s714_s14] sm:$0x3]  ;;  %v306_v37 = vld [vmem:[%s714_s14 + $0x2] sm:$0x3]  ;;  %v308_v38 = vld [vmem:[%s714_s14 + $0x4] sm:$0x3]  ;;  %s722_s17 = sphi %s938_s17, %s298_s17   ;;  %s718_s25 = sphi %s936_s25, %s992_s25   ;;  %s714_s14 = sphi %s991_s14, %s327_s14   ;;  %s710_s15 = sphi %s443_s15, %s463_s15  }
  0x58   : >> { %305 = vst [vmem:[%s710_s15] sm:$0x3] %v304_v36  ;;  %307 = vst [vmem:[%s710_s15 + $0x2] sm:$0x3] %v306_v37  ;;  %v310_v39 = vld [vmem:[%s714_s14 + $0x6] sm:$0x3]  ;;  %s322_s18 = sadd.s32 1, %s718_s25 }
  0x59   : >> { %309 = vst [vmem:[%s710_s15 + $0x4] sm:$0x3] %v308_v38  ;;  %v312_v40 = vld [vmem:[%s714_s14 + $0x8] sm:$0x3]  ;;  %v314_v41 = vld [vmem:[%s714_s14 + $0xa] sm:$0x3]  ;;  %p323_p8 = scmp.ge.s32.totalorder %s322_s18, %s928_s20 }
  0x5a   : >> { %311 = vst [vmem:[%s710_s15 + $0x6] sm:$0x3] %v310_v39  ;;  %313 = vst [vmem:[%s710_s15 + $0x8] sm:$0x3] %v312_v40  ;;  %v316_v42 = vld [vmem:[%s714_s14 + $0xc] sm:$0x3] }
  0x5b   : >> { %315 = vst [vmem:[%s710_s15 + $0xa] sm:$0x3] %v314_v41  ;;  %v318_v43 = vld [vmem:[%s714_s14 + $0xe] sm:$0x3]  ;;  %v320_v44 = vld [vmem:[%s714_s14 + $0x10] sm:$0x3] }
  0x5c   : >> { %317 = vst [vmem:[%s710_s15 + $0xc] sm:$0x3] %v316_v42  ;;  %319 = vst [vmem:[%s710_s15 + $0xe] sm:$0x3] %v318_v43  ;;  %s999_s18 = smov (%p323_p8, %s322_s18), 0  ;;  %s298_s17 = sadd.s32 1, %s722_s17  }
  0x5d   : >> { %321 = vst [vmem:[%s710_s15 + $0x10] sm:$0x3] %v320_v44  ;;  %s325_s21 = smul.u32 18, %s999_s18  ;;  %p297_p9 = scmp.ge.s32.totalorder %s298_s17, %s928_s20 }
  0x5e   : >> { %s992_s25 = smov %s999_s18 }
  0x5f   : >> { %s327_s14 = scalar_lea.vmem %s801_s6, %s325_s21 [#allocation4]   ;;  %s462_s22 = scalar_lea.vmem %s921_s5, %s325_s21 }
  0x60   : >> { %s463_s15 = scalar_lea.vmem %s462_s22, 108   ;;  %300 = sbr.rel (!%p297_p9) target bundleno = 87 (0x57), region = 134 }
  0x67 PF: > { %650 = sdivrem.u32 %s997_s24, 9 }
  0x68   : > { %s552_s23 = smul.u32 18, %s928_s20 }
  0x6a   : > { %s962_s27 = scalar_lea.vmem %s801_s6, %s552_s23 [#allocation4]   ;;  %s965_s28 = scalar_lea.vmem %s921_s5, %s552_s23 }
  0x6b   : > { %s468_s29 = scalar_lea.vmem %s965_s28, 108  }
  0x70   : > { %s651_s30 = spop.drf %650 }
  0x71   : > { %p553_p10 = scmp.le.s32.totalorder %s651_s30, 0 }
  0x72   : > { %s724_s3 = smov (!%p553_p10), %s468_s29   ;;  %s728_s4 = smov (!%p553_p10), %s962_s27  }
  0x73   : > { %495 = sbr.rel (%p553_p10) target bundleno = 132 (0x84), region = 139  ;;  %s732_s7 = smov (!%p553_p10), 0  }
  0x74   : > { %s736_s8 = smov (!%p553_p10), 0  }
  0x7a LB: >> { %v345_v45 = vld [vmem:[%s730_s4] sm:$0x3]  ;;  %s347_s6 = sadd.s32 1, %s734_s7  ;;  %s339_s8 = sadd.s32 1, %s738_s8   ;;  %s738_s8 = sphi %s736_s8, %s339_s8   ;;  %s734_s7 = sphi %s732_s7, %s733_s7   ;;  %s730_s4 = sphi %s728_s4, %s352_s4   ;;  %s726_s3 = sphi %s724_s3, %s473_s3  }
  0x7b   : >> { %346 = vst [vmem:[%s726_s3] sm:$0x3] %v345_v45  ;;  %p348_p11 = scmp.ge.s32.totalorder %s347_s6, %s651_s30  ;;  %p338_p12 = scmp.ge.s32.totalorder %s339_s8, %s651_s30 }
  0x7d   : >> { %s1001_s6 = smov (%p348_p11, %s347_s6), 0  ;;  %341 = sbr.rel (!%p338_p12) target bundleno = 122 (0x7a), region = 145 }
  0x7e   : >> { %s554_s9 = sshll.u32 %s1001_s6, 1  ;;  %s733_s7 = smov %s1001_s6  }
  0x7f   : >> { %s352_s4 = scalar_lea.vmem %s962_s27, %s554_s9 [#allocation4]   ;;  %s472_s26 = scalar_lea.vmem %s965_s28, %s554_s9 }
  0x80   : >> { %s473_s3 = scalar_lea.vmem %s472_s26, 108  }
  0x84 PF: > { %p10_p13 = scmp.ge.s32.totalorder %s771_s0, 4   ;;  %s993_s11 = smov %s702_s12 }
  0x85   : > { %s994_s12 = smov %s778_s19  ;;  %s995_s13 = smov %s771_s0 }
  0x86   :  { %12 = sbr.rel (!%p10_p13) target bundleno = 4 (0x4), region = 156 }

</bundles_post_ra>
